<compile_context>
chip_gen: v7x
topology: tpu7x:2x2x1
jax: 0.10.0
libtpu: 0.0.40
codegen_flags: <defaults>
</compile_context>

<pallas_src>
import jax
import jax.numpy as jnp
from jax.experimental import pallas as pl
from jax.experimental.pallas import tpu as pltpu

_LANE = 128


def _round_up(x, m):
    return ((x + m - 1) // m) * m


def _block_vmem_bytes(rows, cols, itemsize):
    """VMEM bytes of a (rows, cols) block after internal (sublane, 128) tiling."""
    sublane = 8 * (4 // itemsize)  # 8 rows/tile for f32, 16 for bf16
    return _round_up(max(rows, 1), sublane) * _round_up(max(cols, 1), _LANE) * itemsize


def _vmem_limit_bytes(bt, D, H1, H2):
    """Honest footprint (double-buffered IO tiles + resident weights + f32
    intermediates) plus compiler headroom, clamped to ~3/4 of physical VMEM."""
    io = 2 * (_block_vmem_bytes(bt, D, 4) + _block_vmem_bytes(bt, 1, 4))
    weights = 2 * (_block_vmem_bytes(D, H1, 2) + _block_vmem_bytes(H1, H2, 2)
                   + _block_vmem_bytes(1, H1, 4) + 2 * _block_vmem_bytes(1, H2, 4)
                   + _block_vmem_bytes(1, 1, 4))
    inter = (_block_vmem_bytes(bt, D, 2) + _block_vmem_bytes(bt, H1, 4)
             + _block_vmem_bytes(bt, H1, 2) + _block_vmem_bytes(bt, H2, 4)
             + _block_vmem_bytes(bt, H2, 2))
    footprint = io + weights + inter
    try:
        cap = pltpu.get_tpu_info().vmem_capacity_bytes
    except Exception:
        cap = 64 * 1024 * 1024  # v7x per-TensorCore physical VMEM; safe lower bound
    return int(min(max(2 * footprint + (8 << 20), 16 << 20), cap * 3 // 4))


def _choose_batch_tile(B, requested):
    """Pick the per-grid-step batch tile.

    * B <= 128: one full-extent block (legal for any B, zero padding, grid=(1,)).
    * Otherwise: a multiple of 128 capped by `requested`, preferring
      (a) >= 2 grid tiles (so v7x can shard the 'parallel' axis over its 2 TCs),
      (b) minimal tail padding, (c) the largest tile (fewer ~600-cycle steps).
    """
    if B <= _LANE:
        return B
    cap = max(_LANE, min(_round_up(requested, _LANE), _round_up(B, _LANE)))
    best_key, best_bt = None, cap
    for bt in range(_LANE, cap + 1, _LANE):
        n_tiles = (B + bt - 1) // bt
        waste = n_tiles * bt - B
        key = (n_tiles >= 2, -waste, bt)
        if best_key is None or key > best_key:
            best_key, best_bt = key, bt
    return best_bt


def mlp_kernel(x_ref, w1t_ref, b1_ref, w2t_ref, b2_ref, w3_ref, b3_ref, o_ref):
    # Hoist the resident per-step constants once.
    b1 = b1_ref[...]        # (1, H1) f32
    b2 = b2_ref[...]        # (1, H2) f32
    w3 = w3_ref[...]        # (1, H2) f32 (VPU path for the out_features==1 layer)
    b3 = b3_ref[...]        # (1, 1)  f32

    # Layer 1: bf16 cast fused in-kernel (x arrives as one contiguous f32 DMA),
    # MXU matmul with f32 accumulation; bias + ReLU in f32 on the VPU.
    x = x_ref[...].astype(jnp.bfloat16)                              # (bt, D)
    h1 = jnp.dot(x, w1t_ref[...], preferred_element_type=jnp.float32)  # (bt, H1)
    h1 = jnp.maximum(h1 + b1, 0.0)
    # Dropout(p=0.0) == identity in eval mode.
    # TODO(synk): training-mode dropout (p > 0) would need pltpu.prng_* masking.

    # Layer 2.
    h2 = jnp.dot(h1.astype(jnp.bfloat16), w2t_ref[...],
                 preferred_element_type=jnp.float32)                 # (bt, H2)
    h2 = jnp.maximum(h2 + b2, 0.0)

    # Layer 3 (out_features == 1): VPU multiply + XLU lane reduce instead of a
    # 1-column MXU pass (127/128 of the array would be wasted).
    y = jnp.sum(h2 * w3, axis=-1, keepdims=True) + b3                # (bt, 1)
    o_ref[...] = y.astype(o_ref.dtype)


def _prep_params(params):
    """Pre-transpose the tiny weights once (natural-orientation kernel) and cast
    the MXU operands to bf16. No feature-dim padding is needed: all weight /
    bias blocks are full-extent."""
    W1t = jnp.asarray(params["W1"], jnp.float32).T.astype(jnp.bfloat16)  # (D,  H1)
    W2t = jnp.asarray(params["W2"], jnp.float32).T.astype(jnp.bfloat16)  # (H1, H2)
    b1r = jnp.asarray(params["b1"], jnp.float32).reshape(1, -1)          # (1,  H1)
    b2r = jnp.asarray(params["b2"], jnp.float32).reshape(1, -1)          # (1,  H2)
    w3r = jnp.asarray(params["W3"], jnp.float32).reshape(1, -1)          # (1,  H2)
    b3r = jnp.asarray(params["b3"], jnp.float32).reshape(1, 1)           # (1,  1)
    return W1t, b1r, W2t, b2r, w3r, b3r


def forward_network_two_hidden_layers(x, params, *, batch_tile=512, out_activation=None):
    """x: [B, input_dim] float32.  params: PyTorch-oriented (W: [out, in], b: [out])."""
    B, D = x.shape
    H1 = params["W1"].shape[0]
    H2 = params["W2"].shape[0]
    W1t, b1r, W2t, b2r, w3r, b3r = _prep_params(params)

    bt = _choose_batch_tile(B, batch_tile)
    n_tiles = (B + bt - 1) // bt
    B_pad = n_tiles * bt
    if B_pad != B:
        # Only when B isn't a tile multiple: one contiguous zero row-pad of x.
        # (Much cheaper than v1's feature-padded, transposed, bf16 x slab.)
        x_in = jnp.pad(x, ((0, B_pad - B), (0, 0)))
    else:
        x_in = x

    full = lambda i: (0, 0)  # weights/biases: same resident block every grid step
    # NOTE: pipeline_mode=pl.Buffered(1) on the constant-index weight specs would
    # halve resident-weight VMEM if hidden dims ever scale; omitted here since
    # the weights total < 32 KiB.
    y = pl.pallas_call(
        mlp_kernel,
        out_shape=jax.ShapeDtypeStruct((B_pad, 1), jnp.float32),
        grid=(n_tiles,),
        in_specs=[
            pl.BlockSpec((bt, D), lambda i: (i, 0)),   # x batch tile (contiguous f32 rows)
            pl.BlockSpec((D, H1), full),               # W1^T  bf16
            pl.BlockSpec((1, H1), full),               # b1    f32
            pl.BlockSpec((H1, H2), full),              # W2^T  bf16
            pl.BlockSpec((1, H2), full),               # b2    f32
            pl.BlockSpec((1, H2), full),               # W3    f32 row (VPU path)
            pl.BlockSpec((1, 1), full),                # b3    f32
        ],
        out_specs=pl.BlockSpec((bt, 1), lambda i: (i, 0)),
        compiler_params=pltpu.CompilerParams(
            dimension_semantics=("parallel",),
            vmem_limit_bytes=_vmem_limit_bytes(bt, D, H1, H2),
        ),
    )(x_in, W1t, b1r, W2t, b2r, w3r, b3r)

    out = y[:B] if B_pad != B else y
    if out_activation is not None:  # module default: None -> identity
        out = out_activation(out)
    return out


def init_params(key, input_dim, hidden_dim1, hidden_dim2):
    """PyTorch-Linear-style init: U(-1/sqrt(fan_in), 1/sqrt(fan_in)), W: [out, in]."""
    ks = jax.random.split(key, 6)

    def lin(kw, kb, fan_in, fan_out):
        bound = 1.0 / jnp.sqrt(jnp.float32(fan_in))
        W = jax.random.uniform(kw, (fan_out, fan_in), jnp.float32, -bound, bound)
        b = jax.random.uniform(kb, (fan_out,), jnp.float32, -bound, bound)
        return W, b

    W1, b1 = lin(ks[0], ks[1], input_dim, hidden_dim1)
    W2, b2 = lin(ks[2], ks[3], hidden_dim1, hidden_dim2)
    W3, b3 = lin(ks[4], ks[5], hidden_dim2, 1)
    return {"W1": W1, "b1": b1, "W2": W2, "b2": b2, "W3": W3, "b3": b3}


def reference_forward_f32(x, p):
    h1 = jnp.maximum(x @ p["W1"].T + p["b1"], 0.0)
    h2 = jnp.maximum(h1 @ p["W2"].T + p["b2"], 0.0)
    return h2 @ p["W3"].T + p["b3"]


def reference_forward_bf16(x, p):
    """Matches the kernel's mixed precision: bf16 matmul inputs, f32 accumulate."""
    xb = x.astype(jnp.bfloat16)
    w1 = p["W1"].astype(jnp.bfloat16)
    w2 = p["W2"].astype(jnp.bfloat16)
    h1 = jnp.dot(xb, w1.T, preferred_element_type=jnp.float32) + p["b1"]
    h1 = jnp.maximum(h1, 0.0)
    h2 = jnp.dot(h1.astype(jnp.bfloat16), w2.T, preferred_element_type=jnp.float32) + p["b2"]
    h2 = jnp.maximum(h2, 0.0)
    return jnp.sum(h2 * p["W3"][0], axis=-1, keepdims=True) + p["b3"]


if __name__ == "__main__":
    key = jax.random.PRNGKey(0)
    kx, kx2, kp = jax.random.split(key, 3)

    batch, input_dim, hidden1, hidden2 = 16, 32, 64, 32
    x = jax.random.normal(kx, (batch, input_dim), jnp.float32)
    params = init_params(kp, input_dim, hidden1, hidden2)

    # Small batch: single full-extent block, grid=(1,).
    out = forward_network_two_hidden_layers(x, params)
    out = jax.block_until_ready(out)
    assert out.shape == (batch, 1)
    assert jnp.allclose(out, reference_forward_bf16(x, params), atol=1e-3, rtol=1e-3), \
        "mismatch vs bf16-matched reference"
    assert jnp.allclose(out, reference_forward_f32(x, params), atol=5e-2, rtol=5e-2), \
        "mismatch vs f32 reference"

    # Larger, non-tile-multiple batch: exercises the multi-tile 'parallel' grid
    # and the row-pad path.
    batch2 = 300
    x2 = jax.random.normal(kx2, (batch2, input_dim), jnp.float32)
    out2 = jax.block_until_ready(forward_network_two_hidden_layers(x2, params))
    assert out2.shape == (batch2, 1)
    assert jnp.allclose(out2, reference_forward_bf16(x2, params), atol=1e-3, rtol=1e-3), \
        "multi-tile mismatch vs bf16-matched reference"

    print("KERNEL_OK")
</pallas_src>

<mosaic_0001>
module attributes {stable_mosaic.version = 11 : i64} {
  func.func @mlp_kernel(%arg0: i32, %arg1: memref<16x32xf32, #tpu.memory_space<vmem>>, %arg2: memref<32x64xbf16, #tpu.memory_space<vmem>>, %arg3: memref<1x64xf32, #tpu.memory_space<vmem>>, %arg4: memref<64x32xbf16, #tpu.memory_space<vmem>>, %arg5: memref<1x32xf32, #tpu.memory_space<vmem>>, %arg6: memref<1x32xf32, #tpu.memory_space<vmem>>, %arg7: memref<1x1xf32, #tpu.memory_space<vmem>>, %arg8: memref<16x1xf32, #tpu.memory_space<vmem>>) attributes {dimension_semantics = [#tpu.dimension_semantics<parallel>], iteration_bounds = array<i64: 1>, scalar_prefetch = 0 : i64, scratch_operands = 0 : i64, tpu.core_type = #tpu.core_type<tc>, window_params = [{transform_indices = @transform_0, window_bounds = array<i64: 16, 32>}, {pipeline_mode = #tpu.pipeline_mode<synchronous>, transform_indices = @transform_1, window_bounds = array<i64: 32, 64>}, {pipeline_mode = #tpu.pipeline_mode<synchronous>, transform_indices = @transform_2, window_bounds = array<i64: 1, 64>}, {pipeline_mode = #tpu.pipeline_mode<synchronous>, transform_indices = @transform_3, window_bounds = array<i64: 64, 32>}, {pipeline_mode = #tpu.pipeline_mode<synchronous>, transform_indices = @transform_4, window_bounds = array<i64: 1, 32>}, {pipeline_mode = #tpu.pipeline_mode<synchronous>, transform_indices = @transform_5, window_bounds = array<i64: 1, 32>}, {pipeline_mode = #tpu.pipeline_mode<synchronous>, transform_indices = @transform_6, window_bounds = array<i64: 1, 1>}, {transform_indices = @transform_7, window_bounds = array<i64: 16, 1>}]} {
    %c0 = arith.constant 0 : index
    %c0_0 = arith.constant 0 : index
    %0 = vector.load %arg3[%c0, %c0_0] : memref<1x64xf32, #tpu.memory_space<vmem>>, vector<1x64xf32>
    %c0_1 = arith.constant 0 : index
    %c0_2 = arith.constant 0 : index
    %1 = vector.load %arg5[%c0_1, %c0_2] : memref<1x32xf32, #tpu.memory_space<vmem>>, vector<1x32xf32>
    %c0_3 = arith.constant 0 : index
    %c0_4 = arith.constant 0 : index
    %2 = vector.load %arg6[%c0_3, %c0_4] : memref<1x32xf32, #tpu.memory_space<vmem>>, vector<1x32xf32>
    %c0_5 = arith.constant 0 : index
    %c0_6 = arith.constant 0 : index
    %3 = vector.load %arg7[%c0_5, %c0_6] : memref<1x1xf32, #tpu.memory_space<vmem>>, vector<1x1xf32>
    %c0_7 = arith.constant 0 : index
    %c0_8 = arith.constant 0 : index
    %4 = vector.load %arg1[%c0_7, %c0_8] : memref<16x32xf32, #tpu.memory_space<vmem>>, vector<16x32xf32>
    %5 = arith.truncf %4 : vector<16x32xf32> to vector<16x32xbf16>
    %c0_9 = arith.constant 0 : index
    %c0_10 = arith.constant 0 : index
    %6 = vector.load %arg2[%c0_9, %c0_10] : memref<32x64xbf16, #tpu.memory_space<vmem>>, vector<32x64xbf16>
    %cst = arith.constant dense<0.000000e+00> : vector<16x64xf32>
    %7 = tpu.matmul %5, %6, %cst {dimension_numbers = #tpu.dot_dimension_numbers<[1], [0], [0], [1], [0, 0, 1, 1], [], []>} : vector<16x32xbf16>, vector<32x64xbf16>, vector<16x64xf32> -> vector<16x64xf32>
    %8 = vector.broadcast %0 : vector<1x64xf32> to vector<16x64xf32>
    %9 = arith.addf %7, %8 : vector<16x64xf32>
    %cst_11 = arith.constant 0.000000e+00 : f32
    %10 = vector.broadcast %cst_11 : f32 to vector<16x64xf32>
    %11 = arith.maximumf %9, %10 : vector<16x64xf32>
    %12 = arith.truncf %11 : vector<16x64xf32> to vector<16x64xbf16>
    %c0_12 = arith.constant 0 : index
    %c0_13 = arith.constant 0 : index
    %13 = vector.load %arg4[%c0_12, %c0_13] : memref<64x32xbf16, #tpu.memory_space<vmem>>, vector<64x32xbf16>
    %cst_14 = arith.constant dense<0.000000e+00> : vector<16x32xf32>
    %14 = tpu.matmul %12, %13, %cst_14 {dimension_numbers = #tpu.dot_dimension_numbers<[1], [0], [0], [1], [0, 0, 1, 1], [], []>} : vector<16x64xbf16>, vector<64x32xbf16>, vector<16x32xf32> -> vector<16x32xf32>
    %15 = vector.broadcast %1 : vector<1x32xf32> to vector<16x32xf32>
    %16 = arith.addf %14, %15 : vector<16x32xf32>
    %cst_15 = arith.constant 0.000000e+00 : f32
    %17 = vector.broadcast %cst_15 : f32 to vector<16x32xf32>
    %18 = arith.maximumf %16, %17 : vector<16x32xf32>
    %19 = vector.broadcast %2 : vector<1x32xf32> to vector<16x32xf32>
    %20 = arith.mulf %18, %19 : vector<16x32xf32>
    %cst_16 = arith.constant dense<0.000000e+00> : vector<16xf32>
    %21 = vector.multi_reduction <add>, %20, %cst_16 [1] : vector<16x32xf32> to vector<16xf32>
    %22 = vector.shape_cast %21 : vector<16xf32> to vector<16x1xf32>
    %23 = vector.broadcast %3 : vector<1x1xf32> to vector<16x1xf32>
    %24 = arith.addf %22, %23 : vector<16x1xf32>
    %c0_17 = arith.constant 0 : index
    %c0_18 = arith.constant 0 : index
    %25 = vector.load %arg8[%c0_17, %c0_18] : memref<16x1xf32, #tpu.memory_space<vmem>>, vector<16x1xf32>
    tpu.vector_store %arg8[%c0_17, %c0_18], %24 {strides = array<i32>} : memref<16x1xf32, #tpu.memory_space<vmem>>, vector<16x1xf32>,
    return
  }
  func.func @transform_0(%arg0: i32) -> (i32, i32) {
    %c0_i32 = arith.constant 0 : i32
    %c0_i32_0 = arith.constant 0 : i32
    return %arg0, %c0_i32 : i32, i32
  }
  func.func @transform_1(%arg0: i32) -> (i32, i32) {
    %c0_i32 = arith.constant 0 : i32
    %c0_i32_0 = arith.constant 0 : i32
    %c0_i32_1 = arith.constant 0 : i32
    return %c0_i32, %c0_i32_0 : i32, i32
  }
  func.func @transform_2(%arg0: i32) -> (i32, i32) {
    %c0_i32 = arith.constant 0 : i32
    %c0_i32_0 = arith.constant 0 : i32
    %c0_i32_1 = arith.constant 0 : i32
    return %c0_i32, %c0_i32_0 : i32, i32
  }
  func.func @transform_3(%arg0: i32) -> (i32, i32) {
    %c0_i32 = arith.constant 0 : i32
    %c0_i32_0 = arith.constant 0 : i32
    %c0_i32_1 = arith.constant 0 : i32
    return %c0_i32, %c0_i32_0 : i32, i32
  }
  func.func @transform_4(%arg0: i32) -> (i32, i32) {
    %c0_i32 = arith.constant 0 : i32
    %c0_i32_0 = arith.constant 0 : i32
    %c0_i32_1 = arith.constant 0 : i32
    return %c0_i32, %c0_i32_0 : i32, i32
  }
  func.func @transform_5(%arg0: i32) -> (i32, i32) {
    %c0_i32 = arith.constant 0 : i32
    %c0_i32_0 = arith.constant 0 : i32
    %c0_i32_1 = arith.constant 0 : i32
    return %c0_i32, %c0_i32_0 : i32, i32
  }
  func.func @transform_6(%arg0: i32) -> (i32, i32) {
    %c0_i32 = arith.constant 0 : i32
    %c0_i32_0 = arith.constant 0 : i32
    %c0_i32_1 = arith.constant 0 : i32
    return %c0_i32, %c0_i32_0 : i32, i32
  }
  func.func @transform_7(%arg0: i32) -> (i32, i32) {
    %c0_i32 = arith.constant 0 : i32
    %c0_i32_0 = arith.constant 0 : i32
    return %arg0, %c0_i32 : i32, i32
  }
}

</mosaic_0001>

<bundles_post_ra>
// kernel: tpu_custom_call.1
= control target key start
LH: loop header
LB: loop body
LE: loop exit
PB: predicated region body
PF: predicated region fallthrough
CT: control target
= control target key end

     0   :  { %v268_v0 = vmov 0.0   ;;  %vm269_vm0 = vmmov 0   ;;  %vm58_vm1 = vcmask 261120   ;;  %vm144_vm2 = vcmask 523264   ;;  %s355_s1 = inlined_call_operand.vmem [shape: bf16[32,64], index: 1, kind: input, shape index: {}]   ;;  %s356_s0 = inlined_call_operand.vmem [shape: f32[16,32], index: 0, kind: input, shape index: {}]   ;;  %s357_s3 = inlined_call_operand.vmem [shape: bf16[64,32], index: 3, kind: input, shape index: {}]   ;;  %s358_s2 = inlined_call_operand.vmem [shape: f32[1,64], index: 2, kind: input, shape index: {}]   ;;  %s359_s6 = inlined_call_operand.<no memory space> [shape: f32[1,1], index: 6, kind: input, shape index: {}]   ;;  %s360_s4 = inlined_call_operand.vmem [shape: f32[1,32], index: 4, kind: input, shape index: {}]   ;;  %s361_s5 = inlined_call_operand.vmem [shape: f32[1,32], index: 5, kind: input, shape index: {}]   ;;  %s362_s7 = inlined_call_operand.vmem [shape: f32[16,1], index: 7, kind: output, shape index: {}]  }
   0x1   :  { %240 = vmatprep.subr.bf16.mxu0 %v268_v0  ;;  %v262_v1 = vld [vmem:[%s355_s1] sm:$0xff]   ;;  %244 = vmatprep.mubr.msk.bf16.mxu0 %vm269_vm0, %v268_v0  ;;  %v263_v2 = vld [vmem:[%s355_s1 + $0x8] sm:$0xff]   ;;  %v266_v8 = vld [vmem:[%s357_s3 + $0x10] sm:$0xff]   ;;  %v12_v20 = vstv %s359_s6  ;;  %vm213_vm3 = vcmask 7168  }
   0x2   :  { %248 = vmatprep.subr.bf16.mxu1 %v268_v0  ;;  %256 = vmatprep.mubr.msk.bf16.mxu1 %vm269_vm0, %v268_v0  ;;  %v33_v3 = vld [vmem:[%s356_s0] sm:$0xff]  ;;  %v34_v4 = vld [vmem:[%s356_s0 + $0x8] sm:$0xff]  ;;  %v267_v9 = vld [vmem:[%s357_s3 + $0x18] sm:$0xff]   ;;  %13 = vst [vmem:[#allocation2] sm:$0x1] %v12_v20 }
   0x3   :  { %241 = vmatpush3.bf16.msra.mxu0 %v262_v1  ;;  %v264_v5 = vld [vmem:[%s357_s3] sm:$0xff]   ;;  %v265_v6 = vld [vmem:[%s357_s3 + $0x8] sm:$0xff]   ;;  %v35_v7 = vpack.c.bf16 %v34_v4, %v33_v3 }
   0x4   :  { %242 = vmatprep.subr.bf16.mxu0 %v268_v0  ;;  %249 = vmatpush3.bf16.msra.mxu1 %v264_v5  ;;  %v220_v10 = vld [vmem:[%s358_s2] ss:$0 sm:$0xff] }
   0x5   :  { %250 = vmatprep.subr.bf16.mxu1 %v268_v0  ;;  %v224_v21 = vld [vmem:[%s360_s4] ss:$0 sm:$0xff] }
   0x6   :  { %v230_v26 = vld [vmem:[%s361_s5] ss:$0 sm:$0xff] }
   0x7   :  { %243 = vmatpush3.bf16.msra.mxu0 %v263_v2 }
   0x8   :  { %251 = vmatpush3.bf16.msra.mxu1 %v265_v6 }
   0x9   :  { %252 = vmatprep.subr.bf16.mxu1 %v268_v0  ;;  %v231_v35 = vld [vmem:[#allocation2] ss:$0 sm:$0xff] }
   0xa   :  { %245 = vmatmul.mubr.msk.bf16.vlgmr.msra.gmra.mrb[0].mxu0 %vm58_vm1, %v35_v7 }
   0xc   :  { %253 = vmatpush3.bf16.msra.mxu1 %v266_v8 }
   0xd   :  { %254 = vmatprep.subr.bf16.mxu1 %v268_v0 }
  0x10   :  { %255 = vmatpush3.bf16.msra.mxu1 %v267_v9 }
  0xdd   :  { %v96_v11 = vpop.f32.mrb[0].mxu0 }
  0xde   :  { %v97_v12 = vadd.f32 %v220_v10, %v96_v11  ;;  %v246_v13 = vpop.f32.mrb[1].mxu0 }
  0xdf   :  { %v99_v14 = vpop.f32.mrb[2].mxu0 }
  0xe0   :  { %v100_v15 = vadd.f32 %v220_v10, %v99_v14  ;;  %v247_v16 = vpop.f32.mrb[3].mxu0  ;;  %v103_v17 = vmax.f32 %v97_v12, 0.0 }
  0xe2   :  { %v104_v18 = vmax.f32 %v100_v15, 0.0 }
  0xe4   :  { %v105_v19 = vpack.c.bf16 %v104_v18, %v103_v17 }
  0xe6   :  { %257 = vmatmul.mubr.msk.bf16.vlgmr.msra.gmra.mrb[0].mxu1 %vm144_vm2, %v105_v19 }
 0x1b9   :  { %v182_v22 = vpop.f32.mrb[0].mxu1 }
 0x1ba   :  { %v183_v23 = vadd.f32 %v224_v21, %v182_v22  ;;  %v258_v24 = vpop.f32.mrb[1].mxu1 }
 0x1bb   :  { %v185_v25 = vpop.f32.mrb[2].mxu1 }
 0x1bc   :  { %v189_v27 = vmax.f32 %v183_v23, 0.0  ;;  %v186_v28 = vadd.f32 %v224_v21, %v185_v25  ;;  %v259_v29 = vpop.f32.mrb[3].mxu1 }
 0x1be   :  { %v190_v30 = vmax.f32 %v186_v28, 0.0  ;;  %v197_v31 = vmul.f32 %v230_v26, %v189_v27 }
 0x1c0   :  { %v199_v32 = vsel %vm58_vm1, %v197_v31, 0.0  ;;  %v198_v33 = vmul.f32 %v230_v26, %v190_v30 }
 0x1c1   :  { %200 = vadd.xlane.f32.xlu0 %v199_v32 }
 0x1c2   :  { %v202_v34 = vsel %vm58_vm1, %v198_v33, 0.0 }
 0x1c5   :  { %203 = vadd.xlane.f32.xlu0 %v202_v34 }
 0x24e   :  { %v201_v36 = vpop.xlane.xlu0 %200 }
 0x24f   :  { %v211_v37 = vadd.f32 %v231_v35, %v201_v36 }
 0x251   :  { %214 = vst.msk [vmem:[%s362_s7] sm:$0xff] %vm213_vm3, %v211_v37 }
 0x252   :  { %v204_v38 = vpop.xlane.xlu0 %203 }
 0x253   :  { %v212_v39 = vadd.f32 %v231_v35, %v204_v38 }
 0x255   :  { %215 = vst.msk [vmem:[%s362_s7 + $0x8] sm:$0xff] %vm213_vm3, %v212_v39 }

</bundles_post_ra>
